<compile_context>
chip_gen: v7x
topology: tpu7x:2x2x1
jax: 0.10.0
libtpu: 0.0.40
codegen_flags: <defaults>
</compile_context>

<pallas_src>
import functools

import jax
import jax.numpy as jnp
import numpy as np
from jax.experimental import pallas as pl
from jax.experimental.pallas import tpu as pltpu


# ----------------------------------------------------------------------------
# Small helpers.
# ----------------------------------------------------------------------------
def _round_up(x, m):
    return ((x + m - 1) // m) * m


def _pad_to(a, shape):
    pads = [(0, t - s) for s, t in zip(a.shape, shape)]
    if not any(hi for _, hi in pads):
        return a
    return jnp.pad(a, pads)


def _physical_vmem_bytes():
    """Physical per-core VMEM; conservative 64 MiB fallback (v7x) if unknown."""
    try:
        info = pltpu.get_tpu_info()
        v = getattr(info, "vmem_capacity_bytes", None)
        if v:
            return int(v)
    except Exception:
        pass
    return 64 * 1024 * 1024


# ----------------------------------------------------------------------------
# Pallas kernel: recurrence only.  Grid = (batch_blocks, seq_chunks).
# All directions of the layer are processed (interleaved) inside the body.
# ----------------------------------------------------------------------------
def _esn_recurrence_kernel(xw_ref, w_hh_hbm, h0_ref, out_ref, hn_ref,
                           w_vmem, h_scratch, dma_sem, *,
                           leak_rates, t_chunk, seq_len, needs_mask,
                           num_dirs, h_pad, compute_dtype, unroll):
    tau = pl.program_id(1)

    # Once per (batch-block): bring every direction's W_hh into single-buffered
    # VMEM (manual DMA -> no wasted double buffer for resident weights) and
    # load the initial hidden state into the f32 carry while the DMAs fly.
    @pl.when(tau == 0)
    def _init():
        for j in range(num_dirs):
            pltpu.make_async_copy(w_hh_hbm.at[j], w_vmem.at[j],
                                  dma_sem.at[j]).start()
        h_scratch[...] = h0_ref[...].astype(jnp.float32)
        for j in range(num_dirs):
            pltpu.make_async_copy(w_hh_hbm.at[j], w_vmem.at[j],
                                  dma_sem.at[j]).wait()

    w = [w_vmem[j] for j in range(num_dirs)]
    leaks = [jnp.float32(l) for l in leak_rates]

    def step(i, carry):
        t_global = tau * t_chunk + i
        new = []
        # Directions are independent chains: interleaving them here lets the
        # scheduler hide MXU drain / EUP tanh latency (M = batch is tiny).
        for j in range(num_dirs):
            h = carry[j]
            pre = (jnp.dot(h.astype(compute_dtype), w[j],
                           preferred_element_type=jnp.float32)
                   + xw_ref[j, i])                       # xw stays float32
            h_new = (1.0 - leaks[j]) * h + leaks[j] * jnp.tanh(pre)
            out_ref[i, :, pl.ds(j * h_pad, h_pad)] = h_new.astype(out_ref.dtype)
            if needs_mask:
                # Padded tail steps (sequence length not a multiple of the
                # time chunk) must not advance the carried hidden state.
                h_new = jnp.where(t_global < seq_len, h_new, h)
            new.append(h_new)
        return tuple(new)

    init = tuple(h_scratch[j] for j in range(num_dirs))
    final = jax.lax.fori_loop(0, t_chunk, step, init, unroll=unroll)
    for j in range(num_dirs):
        h_scratch[j] = final[j]

    @pl.when(tau == pl.num_programs(1) - 1)
    def _finalize():
        for j in range(num_dirs):
            hn_ref[j] = final[j].astype(hn_ref.dtype)


# ----------------------------------------------------------------------------
# Wrapper: one ESN layer (all directions fused into one pallas_call).
# ----------------------------------------------------------------------------
def esn_layer_forward(x, w_in, w_hh, b, h0, leaks, *,
                      compute_dtype=jnp.bfloat16,
                      max_time_chunk=64,
                      batch_blocks=1):
    """Run one ESN layer (D directions fused) over a full sequence.

    x: (S, B, In)   w_in: (D, In, H)   w_hh: (D, H, H)   b: (D, H)
    h0: (D, B, H)   leaks: tuple of D python floats.
    Returns (output (S, B, D*H), h_n (D, B, H)).
    """
    S, B, In = x.shape
    D, H, _ = w_hh.shape
    out_dtype = x.dtype

    B_pad = _round_up(B, 8)        # f32 sublane
    H_pad = _round_up(H, 256)      # full 256x256 MXU tiles on v6e / v7x

    # Batch-block parallel axis (engages the 2nd TensorCore on v7x when the
    # layer is mono-directional and B_pad >= 16; leave at 1 on v5e/v6e).
    bb = max(1, int(batch_blocks))
    bb = min(bb, B_pad // 8)
    while (B_pad // 8) % bb:
        bb -= 1
    b_blk = B_pad // bb

    cbytes = np.dtype(compute_dtype).itemsize
    out_bytes = np.dtype(out_dtype).itemsize

    # ---- adaptive time chunk against the physical VMEM budget -------------
    budget = _physical_vmem_bytes() - (8 << 20)          # ~8 MiB headroom
    fixed = (D * H_pad * H_pad * cbytes                   # resident W_hh (x1)
             + D * b_blk * H_pad * 4                      # f32 hidden carry
             + 2 * D * b_blk * H_pad * 4                  # h0 pipeline bufs
             + 2 * D * b_blk * H_pad * out_bytes)         # h_n pipeline bufs
    per_step = (2 * D * b_blk * H_pad * 4                 # xw double buffer
                + 2 * D * b_blk * H_pad * out_bytes)      # out double buffer
    t_vmem_cap = max(1, (budget - fixed) // per_step)
    t_chunk = int(max(1, min(max_time_chunk, S, t_vmem_cap)))
    n_tau = -(-S // t_chunk)
    S_pad = n_tau * t_chunk
    needs_mask = (S_pad != S)
    unroll = True if t_chunk <= 16 else 8                 # partial unroll

    needed = fixed + per_step * t_chunk
    vmem_limit = int(min(budget, max(needed + (4 << 20), 32 << 20)))

    # ---- pad operands -------------------------------------------------------
    x_p = _pad_to(x, (S, B_pad, In))
    w_in_p = _pad_to(w_in, (D, In, H_pad))
    w_hh_p = _pad_to(w_hh, (D, H_pad, H_pad)).astype(compute_dtype)
    b_p = _pad_to(b, (D, H_pad)).astype(jnp.float32)
    h0_p = _pad_to(h0, (D, B_pad, H_pad)).astype(jnp.float32)

    # ---- hoisted input projection (one MXU-friendly matmul, f32) ----------
    xw = jnp.einsum("sbi,dih->dsbh", x_p.astype(jnp.float32),
                    w_in_p.astype(jnp.float32),
                    preferred_element_type=jnp.float32)
    xw = xw + b_p[:, None, None, :]
    if D == 2:
        # The backward direction walks the REVERSED sequence: pre-flip its
        # projection so every direction walks forward inside the kernel and
        # padding always lands at the end.
        xw = jnp.concatenate([xw[:1], jnp.flip(xw[1:], axis=1)], axis=0)
    if S_pad != S:
        xw = jnp.pad(xw, ((0, 0), (0, S_pad - S), (0, 0), (0, 0)))

    kernel = functools.partial(
        _esn_recurrence_kernel,
        leak_rates=tuple(float(l) for l in leaks),
        t_chunk=t_chunk, seq_len=S, needs_mask=needs_mask,
        num_dirs=D, h_pad=H_pad, compute_dtype=compute_dtype, unroll=unroll)

    out_pad, hn_pad = pl.pallas_call(
        kernel,
        out_shape=(jax.ShapeDtypeStruct((S_pad, B_pad, D * H_pad), out_dtype),
                   jax.ShapeDtypeStruct((D, B_pad, H_pad), out_dtype)),
        grid_spec=pltpu.PrefetchScalarGridSpec(
            num_scalar_prefetch=0,
            grid=(bb, n_tau),
            in_specs=[
                # xw chunk for all directions (f32).
                pl.BlockSpec((D, t_chunk, b_blk, H_pad),
                             lambda bi, t: (0, t, bi, 0)),
                # W_hh stays in HBM; DMA'd manually once per batch block.
                pl.BlockSpec(memory_space=pl.ANY),
                # initial hidden state (f32).
                pl.BlockSpec((D, b_blk, H_pad), lambda bi, t: (0, bi, 0)),
            ],
            out_specs=(
                # lane-dense sequence output; direction j owns lane block j.
                pl.BlockSpec((t_chunk, b_blk, D * H_pad),
                             lambda bi, t: (t, bi, 0)),
                # final hidden state (resident across the time axis).
                pl.BlockSpec((D, b_blk, H_pad), lambda bi, t: (0, bi, 0)),
            ),
            scratch_shapes=[
                pltpu.VMEM((D, H_pad, H_pad), compute_dtype),  # resident W_hh
                pltpu.VMEM((D, b_blk, H_pad), jnp.float32),    # f32 h carry
                pltpu.SemaphoreType.DMA((D,)),                 # W_hh copy sems
            ],
        ),
        compiler_params=pltpu.CompilerParams(
            dimension_semantics=("parallel", "arbitrary"),
            vmem_limit_bytes=vmem_limit),
    )(xw, w_hh_p, h0_p)

    # ---- strip padding ------------------------------------------------------
    out = (out_pad.reshape(S_pad, B_pad, D, H_pad)[:S, :B, :, :H]
           .reshape(S, B, D * H))
    hn = hn_pad[:, :B, :H]
    return out, hn


# ----------------------------------------------------------------------------
# ESNBase equivalent (plain-JAX glue around the fused Pallas layer kernel).
# ----------------------------------------------------------------------------
class ESNBaseJax:
    def __init__(self, input_size, reservoir_size, cells, cells_bw=None,
                 num_layers=1, compute_dtype=jnp.bfloat16,
                 max_time_chunk=64, batch_blocks=1):
        self.input_size = input_size
        self.reservoir_size = reservoir_size
        self.num_layers = num_layers
        self.bidirectional = cells_bw is not None
        self.num_directions = 2 if self.bidirectional else 1
        self._cells = cells          # list of dicts: w_in, w_hh, b, leak
        self._cells_bw = cells_bw
        self._compute_dtype = compute_dtype
        self._max_time_chunk = max_time_chunk
        self._batch_blocks = batch_blocks

    def __call__(self, inp, h_0=None):
        batch = inp.shape[1]
        if h_0 is None:
            h_0 = jnp.zeros((self.num_layers * self.num_directions, batch,
                             self.reservoir_size), dtype=inp.dtype)
        next_layer_input = inp
        h_parts = []
        for lyr in range(self.num_layers):
            if self.bidirectional:
                # NOTE: backward outputs are stored in reversed-time order and
                # concatenated directly (no re-flip) -- torch_rc quirk.
                cf, cb = self._cells[lyr], self._cells_bw[lyr]
                w_in = jnp.stack([cf["w_in"], cb["w_in"]])
                w_hh = jnp.stack([cf["w_hh"], cb["w_hh"]])
                b = jnp.stack([cf["b"], cb["b"]])
                h0 = h_0[2 * lyr: 2 * lyr + 2]
                leaks = (cf["leak"], cb["leak"])
            else:
                c = self._cells[lyr]
                w_in, w_hh, b = c["w_in"][None], c["w_hh"][None], c["b"][None]
                h0 = h_0[lyr: lyr + 1]
                leaks = (c["leak"],)
            next_layer_input, hn = esn_layer_forward(
                next_layer_input, w_in, w_hh, b, h0, leaks,
                compute_dtype=self._compute_dtype,
                max_time_chunk=self._max_time_chunk,
                batch_blocks=self._batch_blocks)
            h_parts.append(hn)
        return next_layer_input, jnp.concatenate(h_parts, axis=0)


# ----------------------------------------------------------------------------
# Pure-JAX reference (mirrors the PyTorch loops) for correctness checking.
# ----------------------------------------------------------------------------
def _ref_layer(x, w_in, w_hh, b, h0, leak):
    outs = []
    h = h0
    for t in range(x.shape[0]):
        pre = x[t] @ w_in + h @ w_hh + b
        h = (1.0 - leak) * h + leak * jnp.tanh(pre)
        outs.append(h)
    return jnp.stack(outs), h


def _ref_forward(model, inp, h_0=None):
    batch = inp.shape[1]
    if h_0 is None:
        h_0 = jnp.zeros((model.num_layers * model.num_directions, batch,
                         model.reservoir_size), dtype=inp.dtype)
    nxt = inp
    h_l = []
    if not model.bidirectional:
        for lyr, c in enumerate(model._cells):
            nxt, hn = _ref_layer(nxt, c["w_in"], c["w_hh"], c["b"],
                                 h_0[lyr], c["leak"])
            h_l.append(hn)
    else:
        for lyr in range(model.num_layers):
            cf, cb = model._cells[lyr], model._cells_bw[lyr]
            of, hf = _ref_layer(nxt, cf["w_in"], cf["w_hh"], cf["b"],
                                h_0[2 * lyr + 0], cf["leak"])
            ob, hb = _ref_layer(jnp.flip(nxt, axis=0), cb["w_in"], cb["w_hh"],
                                cb["b"], h_0[2 * lyr + 1], cb["leak"])
            h_l += [hf, hb]
            nxt = jnp.concatenate([of, ob], axis=2)
    return nxt, jnp.stack(h_l)


# ----------------------------------------------------------------------------
# Deterministic parameter construction.
# ----------------------------------------------------------------------------
def make_cell(key, in_size, hidden, leak):
    k1, k2, k3 = jax.random.split(key, 3)
    w_in = (jax.random.normal(k1, (in_size, hidden), jnp.float32)
            / np.sqrt(in_size))
    w_hh = (jax.random.normal(k2, (hidden, hidden), jnp.float32)
            * (0.9 / np.sqrt(hidden)))
    b = jax.random.normal(k3, (hidden,), jnp.float32) * 0.1
    return {"w_in": w_in, "w_hh": w_hh, "b": b, "leak": leak}


if __name__ == "__main__":
    IN, HID = 4, 32
    key = jax.random.PRNGKey(0)
    kx, kh, kc = jax.random.split(key, 3)
    keys = jax.random.split(kc, 6)

    # ---- Test A: mono, 2 layers, odd seq length (tail masking), f32 --------
    S, B = 11, 2
    x = jax.random.normal(kx, (S, B, IN), jnp.float32)
    cells_mono = [make_cell(keys[0], IN, HID, 0.5),
                  make_cell(keys[1], HID, HID, 0.7)]
    esn_mono = ESNBaseJax(IN, HID, cells_mono, cells_bw=None, num_layers=2,
                          compute_dtype=jnp.float32, max_time_chunk=4)
    h0_mono = jax.random.normal(kh, (2, B, HID), jnp.float32) * 0.3
    out_m, hn_m = esn_mono(x, h0_mono)
    jax.block_until_ready((out_m, hn_m))
    ref_out_m, ref_hn_m = _ref_forward(esn_mono, x, h0_mono)
    np.testing.assert_allclose(np.asarray(out_m), np.asarray(ref_out_m),
                               rtol=1e-4, atol=1e-4)
    np.testing.assert_allclose(np.asarray(hn_m), np.asarray(ref_hn_m),
                               rtol=1e-4, atol=1e-4)
    assert out_m.shape == (S, B, HID) and hn_m.shape == (2, B, HID)

    # ---- Test B: bidirectional, odd seq length, nonzero h0, f32 ------------
    cells_fw = [make_cell(keys[2], IN, HID, 0.6)]
    cells_bw = [make_cell(keys[3], IN, HID, 0.45)]
    esn_bi = ESNBaseJax(IN, HID, cells_fw, cells_bw=cells_bw, num_layers=1,
                        compute_dtype=jnp.float32, max_time_chunk=4)
    h0_bi = jax.random.normal(keys[4], (2, B, HID), jnp.float32) * 0.3
    out_b, hn_b = esn_bi(x, h0_bi)
    jax.block_until_ready((out_b, hn_b))
    ref_out_b, ref_hn_b = _ref_forward(esn_bi, x, h0_bi)
    np.testing.assert_allclose(np.asarray(out_b), np.asarray(ref_out_b),
                               rtol=1e-4, atol=1e-4)
    np.testing.assert_allclose(np.asarray(hn_b), np.asarray(ref_hn_b),
                               rtol=1e-4, atol=1e-4)
    assert out_b.shape == (S, B, 2 * HID) and hn_b.shape == (2, B, HID)

    # ---- Test C: bidirectional, default bf16 compute path ------------------
    S2 = 8
    x2 = jax.random.normal(keys[5], (S2, B, IN), jnp.float32)
    esn_bi_bf16 = ESNBaseJax(IN, HID, cells_fw, cells_bw=cells_bw,
                             num_layers=1)   # compute_dtype = bfloat16
    out_c, hn_c = esn_bi_bf16(x2)
    jax.block_until_ready((out_c, hn_c))
    ref_out_c, ref_hn_c = _ref_forward(esn_bi_bf16, x2)
    np.testing.assert_allclose(np.asarray(out_c), np.asarray(ref_out_c),
                               rtol=1e-1, atol=1e-1)
    np.testing.assert_allclose(np.asarray(hn_c), np.asarray(ref_hn_c),
                               rtol=1e-1, atol=1e-1)
    assert bool(jnp.all(jnp.isfinite(out_c))) and bool(jnp.all(jnp.isfinite(hn_c)))
    assert out_c.shape == (S2, B, 2 * HID) and hn_c.shape == (2, B, HID)

    # ---- Test D: mono, larger batch split across 2 parallel batch blocks ---
    B2 = 16
    x3 = jax.random.normal(keys[1], (S2, B2, IN), jnp.float32)
    esn_split = ESNBaseJax(IN, HID, [cells_mono[0]], cells_bw=None,
                           num_layers=1, compute_dtype=jnp.float32,
                           batch_blocks=2)
    out_d, hn_d = esn_split(x3)
    jax.block_until_ready((out_d, hn_d))
    ref_out_d, ref_hn_d = _ref_forward(esn_split, x3)
    np.testing.assert_allclose(np.asarray(out_d), np.asarray(ref_out_d),
                               rtol=1e-4, atol=1e-4)
    np.testing.assert_allclose(np.asarray(hn_d), np.asarray(ref_hn_d),
                               rtol=1e-4, atol=1e-4)
    assert out_d.shape == (S2, B2, HID) and hn_d.shape == (1, B2, HID)

    print("KERNEL_OK")
</pallas_src>

<mosaic_0001>
module attributes {stable_mosaic.version = 11 : i64} {
  func.func @_esn_recurrence_kernel(%arg0: i32, %arg1: i32, %arg2: memref<1x4x8x256xf32, #tpu.memory_space<vmem>>, %arg3: memref<1x256x256xf32, #tpu.memory_space<any>>, %arg4: memref<1x8x256xf32, #tpu.memory_space<vmem>>, %arg5: memref<4x8x256xf32, #tpu.memory_space<vmem>>, %arg6: memref<1x8x256xf32, #tpu.memory_space<vmem>>, %arg7: memref<1x256x256xf32, #tpu.memory_space<vmem>>, %arg8: memref<1x8x256xf32, #tpu.memory_space<vmem>>, %arg9: memref<1x!tpu.dma_semaphore, #tpu.memory_space<semaphore_mem>>) attributes {dimension_semantics = [#tpu.dimension_semantics<parallel>, #tpu.dimension_semantics<arbitrary>], iteration_bounds = array<i64: 1, 3>, scalar_prefetch = 0 : i64, scratch_operands = 3 : i64, tpu.core_type = #tpu.core_type<tc>, window_params = [{transform_indices = @transform_0, window_bounds = array<i64: 1, 4, 8, 256>}, {}, {transform_indices = @transform_2, window_bounds = array<i64: 1, 8, 256>}, {transform_indices = @transform_3, window_bounds = array<i64: 4, 8, 256>}, {transform_indices = @transform_4, window_bounds = array<i64: 1, 8, 256>}]} {
    %c0_i32 = arith.constant 0 : i32
    %0 = arith.cmpi eq, %arg1, %c0_i32 : i32
    %1 = arith.extui %0 : i1 to i32
    %c0_i32_0 = arith.constant 0 : i32
    %2 = arith.cmpi ne, %1, %c0_i32_0 : i32
    scf.if %2 {
      %c0_i32_47 = arith.constant 0 : i32
      %c0_i32_48 = arith.constant 0 : i32
      %c0_i32_49 = arith.constant 0 : i32
      %c0_i32_50 = arith.constant 0 : i32
      %c0_i32_51 = arith.constant 0 : i32
      %93 = tpu.memref_slice %arg3[%c0_i32_47, %c0_i32_50, %c0_i32_51] : memref<1x256x256xf32, #tpu.memory_space<any>> -> memref<1x256x256xf32, #tpu.memory_space<any>>
      %94 = tpu.memref_squeeze %93 : memref<1x256x256xf32, #tpu.memory_space<any>> -> memref<256x256xf32, #tpu.memory_space<any>>
      %c0_i32_52 = arith.constant 0 : i32
      %c0_i32_53 = arith.constant 0 : i32
      %95 = tpu.memref_slice %arg7[%c0_i32_48, %c0_i32_52, %c0_i32_53] : memref<1x256x256xf32, #tpu.memory_space<vmem>> -> memref<1x256x256xf32, #tpu.memory_space<vmem>>
      %96 = tpu.memref_squeeze %95 : memref<1x256x256xf32, #tpu.memory_space<vmem>> -> memref<256x256xf32, #tpu.memory_space<vmem>>
      %97 = tpu.memref_slice %arg9[%c0_i32_49] : memref<1x!tpu.dma_semaphore, #tpu.memory_space<semaphore_mem>> -> memref<1x!tpu.dma_semaphore, #tpu.memory_space<semaphore_mem>>
      %98 = tpu.memref_squeeze %97 : memref<1x!tpu.dma_semaphore, #tpu.memory_space<semaphore_mem>> -> memref<!tpu.dma_semaphore, #tpu.memory_space<semaphore_mem>>
      tpu.enqueue_dma source(%94 : memref<256x256xf32, #tpu.memory_space<any>>) target(%96 : memref<256x256xf32, #tpu.memory_space<vmem>>) target_semaphore(%98 : memref<!tpu.dma_semaphore, #tpu.memory_space<semaphore_mem>>)
      %c0_54 = arith.constant 0 : index
      %c0_55 = arith.constant 0 : index
      %c0_56 = arith.constant 0 : index
      %99 = vector.load %arg4[%c0_54, %c0_55, %c0_56] : memref<1x8x256xf32, #tpu.memory_space<vmem>>, vector<1x8x256xf32>
      %c0_57 = arith.constant 0 : index
      %c0_58 = arith.constant 0 : index
      %c0_59 = arith.constant 0 : index
      %100 = vector.load %arg8[%c0_57, %c0_58, %c0_59] : memref<1x8x256xf32, #tpu.memory_space<vmem>>, vector<1x8x256xf32>
      tpu.vector_store %arg8[%c0_57, %c0_58, %c0_59], %99 {strides = array<i32>} : memref<1x8x256xf32, #tpu.memory_space<vmem>>, vector<1x8x256xf32>,
      %c0_i32_60 = arith.constant 0 : i32
      %c0_i32_61 = arith.constant 0 : i32
      %c0_i32_62 = arith.constant 0 : i32
      %c0_i32_63 = arith.constant 0 : i32
      %c0_i32_64 = arith.constant 0 : i32
      %101 = tpu.memref_slice %arg3[%c0_i32_60, %c0_i32_63, %c0_i32_64] : memref<1x256x256xf32, #tpu.memory_space<any>> -> memref<1x256x256xf32, #tpu.memory_space<any>>
      %102 = tpu.memref_squeeze %101 : memref<1x256x256xf32, #tpu.memory_space<any>> -> memref<256x256xf32, #tpu.memory_space<any>>
      %c0_i32_65 = arith.constant 0 : i32
      %c0_i32_66 = arith.constant 0 : i32
      %103 = tpu.memref_slice %arg7[%c0_i32_61, %c0_i32_65, %c0_i32_66] : memref<1x256x256xf32, #tpu.memory_space<vmem>> -> memref<1x256x256xf32, #tpu.memory_space<vmem>>
      %104 = tpu.memref_squeeze %103 : memref<1x256x256xf32, #tpu.memory_space<vmem>> -> memref<256x256xf32, #tpu.memory_space<vmem>>
      %105 = tpu.memref_slice %arg9[%c0_i32_62] : memref<1x!tpu.dma_semaphore, #tpu.memory_space<semaphore_mem>> -> memref<1x!tpu.dma_semaphore, #tpu.memory_space<semaphore_mem>>
      %106 = tpu.memref_squeeze %105 : memref<1x!tpu.dma_semaphore, #tpu.memory_space<semaphore_mem>> -> memref<!tpu.dma_semaphore, #tpu.memory_space<semaphore_mem>>
      tpu.wait_dma2 semaphore(%106 : memref<!tpu.dma_semaphore, #tpu.memory_space<semaphore_mem>>) src(%102 : memref<256x256xf32, #tpu.memory_space<any>>) dst(%104 : memref<256x256xf32, #tpu.memory_space<vmem>>)
    } else {
    }
    %c0 = arith.constant 0 : index
    %c0_1 = arith.constant 0 : index
    %c0_2 = arith.constant 0 : index
    %3 = vector.load %arg7[%c0, %c0_1, %c0_2] : memref<1x256x256xf32, #tpu.memory_space<vmem>>, vector<1x256x256xf32>
    %4 = vector.shape_cast %3 : vector<1x256x256xf32> to vector<256x256xf32>
    %c0_3 = arith.constant 0 : index
    %c0_4 = arith.constant 0 : index
    %c0_5 = arith.constant 0 : index
    %5 = vector.load %arg8[%c0_3, %c0_4, %c0_5] : memref<1x8x256xf32, #tpu.memory_space<vmem>>, vector<1x8x256xf32>
    %6 = vector.shape_cast %5 : vector<1x8x256xf32> to vector<8x256xf32>
    %cst = arith.constant 5.000000e-01 : f32
    %c0_i32_6 = arith.constant 0 : i32
    %c4_i32 = arith.constant 4 : i32
    %7 = arith.muli %arg1, %c4_i32 : i32
    %8 = arith.addi %7, %c0_i32_6 : i32
    %cst_7 = arith.constant dense<0.000000e+00> : vector<8x256xf32>
    %9 = tpu.matmul %6, %4, %cst_7 {dimension_numbers = #tpu.dot_dimension_numbers<[1], [0], [0], [1], [0, 0, 1, 1], [], []>} : vector<8x256xf32>, vector<256x256xf32>, vector<8x256xf32> -> vector<8x256xf32>
    %c0_8 = arith.constant 0 : index
    %10 = arith.index_cast %c0_i32_6 : i32 to index
    %c0_9 = arith.constant 0 : index
    %c0_10 = arith.constant 0 : index
    %11 = vector.load %arg2[%c0_8, %10, %c0_9, %c0_10] : memref<1x4x8x256xf32, #tpu.memory_space<vmem>>, vector<1x1x8x256xf32>
    %12 = vector.shape_cast %11 : vector<1x1x8x256xf32> to vector<8x256xf32>
    %13 = arith.addf %9, %12 : vector<8x256xf32>
    %cst_11 = arith.constant 1.000000e+00 : f32
    %14 = arith.subf %cst_11, %cst : f32
    %15 = vector.broadcast %14 : f32 to vector<8x256xf32>
    %16 = arith.mulf %15, %6 : vector<8x256xf32>
    %17 = math.tanh %13 : vector<8x256xf32>
    %18 = vector.broadcast %cst : f32 to vector<8x256xf32>
    %19 = arith.mulf %18, %17 : vector<8x256xf32>
    %20 = arith.addf %16, %19 : vector<8x256xf32>
    %21 = arith.index_cast %c0_i32_6 : i32 to index
    %c0_12 = arith.constant 0 : index
    %c0_13 = arith.constant 0 : index
    %22 = vector.load %arg5[%21, %c0_12, %c0_13] : memref<4x8x256xf32, #tpu.memory_space<vmem>>, vector<1x8x256xf32>
    %23 = vector.shape_cast %22 : vector<1x8x256xf32> to vector<8x256xf32>
    %24 = vector.shape_cast %20 : vector<8x256xf32> to vector<1x8x256xf32>
    tpu.vector_store %arg5[%21, %c0_12, %c0_13], %24 {strides = array<i32>} : memref<4x8x256xf32, #tpu.memory_space<vmem>>, vector<1x8x256xf32>,
    %c11_i32 = arith.constant 11 : i32
    %25 = arith.cmpi slt, %8, %c11_i32 : i32
    %26 = arith.select %25, %20, %6 : vector<8x256xf32>
    %c1_i32 = arith.constant 1 : i32
    %c4_i32_14 = arith.constant 4 : i32
    %27 = arith.muli %arg1, %c4_i32_14 : i32
    %28 = arith.addi %27, %c1_i32 : i32
    %cst_15 = arith.constant dense<0.000000e+00> : vector<8x256xf32>
    %29 = tpu.matmul %26, %4, %cst_15 {dimension_numbers = #tpu.dot_dimension_numbers<[1], [0], [0], [1], [0, 0, 1, 1], [], []>} : vector<8x256xf32>, vector<256x256xf32>, vector<8x256xf32> -> vector<8x256xf32>
    %c0_16 = arith.constant 0 : index
    %30 = arith.index_cast %c1_i32 : i32 to index
    %c0_17 = arith.constant 0 : index
    %c0_18 = arith.constant 0 : index
    %31 = vector.load %arg2[%c0_16, %30, %c0_17, %c0_18] : memref<1x4x8x256xf32, #tpu.memory_space<vmem>>, vector<1x1x8x256xf32>
    %32 = vector.shape_cast %31 : vector<1x1x8x256xf32> to vector<8x256xf32>
    %33 = arith.addf %29, %32 : vector<8x256xf32>
    %cst_19 = arith.constant 1.000000e+00 : f32
    %34 = arith.subf %cst_19, %cst : f32
    %35 = vector.broadcast %34 : f32 to vector<8x256xf32>
    %36 = arith.mulf %35, %26 : vector<8x256xf32>
    %37 = math.tanh %33 : vector<8x256xf32>
    %38 = vector.broadcast %cst : f32 to vector<8x256xf32>
    %39 = arith.mulf %38, %37 : vector<8x256xf32>
    %40 = arith.addf %36, %39 : vector<8x256xf32>
    %41 = arith.index_cast %c1_i32 : i32 to index
    %c0_20 = arith.constant 0 : index
    %c0_21 = arith.constant 0 : index
    %42 = vector.load %arg5[%41, %c0_20, %c0_21] : memref<4x8x256xf32, #tpu.memory_space<vmem>>, vector<1x8x256xf32>
    %43 = vector.shape_cast %42 : vector<1x8x256xf32> to vector<8x256xf32>
    %44 = vector.shape_cast %40 : vector<8x256xf32> to vector<1x8x256xf32>
    tpu.vector_store %arg5[%41, %c0_20, %c0_21], %44 {strides = array<i32>} : memref<4x8x256xf32, #tpu.memory_space<vmem>>, vector<1x8x256xf32>,
    %c11_i32_22 = arith.constant 11 : i32
    %45 = arith.cmpi slt, %28, %c11_i32_22 : i32
    %46 = arith.select %45, %40, %26 : vector<8x256xf32>
    %c2_i32 = arith.constant 2 : i32
    %c4_i32_23 = arith.constant 4 : i32
    %47 = arith.muli %arg1, %c4_i32_23 : i32
    %48 = arith.addi %47, %c2_i32 : i32
    %cst_24 = arith.constant dense<0.000000e+00> : vector<8x256xf32>
    %49 = tpu.matmul %46, %4, %cst_24 {dimension_numbers = #tpu.dot_dimension_numbers<[1], [0], [0], [1], [0, 0, 1, 1], [], []>} : vector<8x256xf32>, vector<256x256xf32>, vector<8x256xf32> -> vector<8x256xf32>
    %c0_25 = arith.constant 0 : index
    %50 = arith.index_cast %c2_i32 : i32 to index
    %c0_26 = arith.constant 0 : index
    %c0_27 = arith.constant 0 : index
    %51 = vector.load %arg2[%c0_25, %50, %c0_26, %c0_27] : memref<1x4x8x256xf32, #tpu.memory_space<vmem>>, vector<1x1x8x256xf32>
    %52 = vector.shape_cast %51 : vector<1x1x8x256xf32> to vector<8x256xf32>
    %53 = arith.addf %49, %52 : vector<8x256xf32>
    %cst_28 = arith.constant 1.000000e+00 : f32
    %54 = arith.subf %cst_28, %cst : f32
    %55 = vector.broadcast %54 : f32 to vector<8x256xf32>
    %56 = arith.mulf %55, %46 : vector<8x256xf32>
    %57 = math.tanh %53 : vector<8x256xf32>
    %58 = vector.broadcast %cst : f32 to vector<8x256xf32>
    %59 = arith.mulf %58, %57 : vector<8x256xf32>
    %60 = arith.addf %56, %59 : vector<8x256xf32>
    %61 = arith.index_cast %c2_i32 : i32 to index
    %c0_29 = arith.constant 0 : index
    %c0_30 = arith.constant 0 : index
    %62 = vector.load %arg5[%61, %c0_29, %c0_30] : memref<4x8x256xf32, #tpu.memory_space<vmem>>, vector<1x8x256xf32>
    %63 = vector.shape_cast %62 : vector<1x8x256xf32> to vector<8x256xf32>
    %64 = vector.shape_cast %60 : vector<8x256xf32> to vector<1x8x256xf32>
    tpu.vector_store %arg5[%61, %c0_29, %c0_30], %64 {strides = array<i32>} : memref<4x8x256xf32, #tpu.memory_space<vmem>>, vector<1x8x256xf32>,
    %c11_i32_31 = arith.constant 11 : i32
    %65 = arith.cmpi slt, %48, %c11_i32_31 : i32
    %66 = arith.select %65, %60, %46 : vector<8x256xf32>
    %c3_i32 = arith.constant 3 : i32
    %c4_i32_32 = arith.constant 4 : i32
    %67 = arith.muli %arg1, %c4_i32_32 : i32
    %68 = arith.addi %67, %c3_i32 : i32
    %cst_33 = arith.constant dense<0.000000e+00> : vector<8x256xf32>
    %69 = tpu.matmul %66, %4, %cst_33 {dimension_numbers = #tpu.dot_dimension_numbers<[1], [0], [0], [1], [0, 0, 1, 1], [], []>} : vector<8x256xf32>, vector<256x256xf32>, vector<8x256xf32> -> vector<8x256xf32>
    %c0_34 = arith.constant 0 : index
    %70 = arith.index_cast %c3_i32 : i32 to index
    %c0_35 = arith.constant 0 : index
    %c0_36 = arith.constant 0 : index
    %71 = vector.load %arg2[%c0_34, %70, %c0_35, %c0_36] : memref<1x4x8x256xf32, #tpu.memory_space<vmem>>, vector<1x1x8x256xf32>
    %72 = vector.shape_cast %71 : vector<1x1x8x256xf32> to vector<8x256xf32>
    %73 = arith.addf %69, %72 : vector<8x256xf32>
    %cst_37 = arith.constant 1.000000e+00 : f32
    %74 = arith.subf %cst_37, %cst : f32
    %75 = vector.broadcast %74 : f32 to vector<8x256xf32>
    %76 = arith.mulf %75, %66 : vector<8x256xf32>
    %77 = math.tanh %73 : vector<8x256xf32>
    %78 = vector.broadcast %cst : f32 to vector<8x256xf32>
    %79 = arith.mulf %78, %77 : vector<8x256xf32>
    %80 = arith.addf %76, %79 : vector<8x256xf32>
    %81 = arith.index_cast %c3_i32 : i32 to index
    %c0_38 = arith.constant 0 : index
    %c0_39 = arith.constant 0 : index
    %82 = vector.load %arg5[%81, %c0_38, %c0_39] : memref<4x8x256xf32, #tpu.memory_space<vmem>>, vector<1x8x256xf32>
    %83 = vector.shape_cast %82 : vector<1x8x256xf32> to vector<8x256xf32>
    %84 = vector.shape_cast %80 : vector<8x256xf32> to vector<1x8x256xf32>
    tpu.vector_store %arg5[%81, %c0_38, %c0_39], %84 {strides = array<i32>} : memref<4x8x256xf32, #tpu.memory_space<vmem>>, vector<1x8x256xf32>,
    %c11_i32_40 = arith.constant 11 : i32
    %85 = arith.cmpi slt, %68, %c11_i32_40 : i32
    %86 = arith.select %85, %80, %66 : vector<8x256xf32>
    %c4_i32_41 = arith.constant 4 : i32
    %c0_42 = arith.constant 0 : index
    %c0_43 = arith.constant 0 : index
    %c0_44 = arith.constant 0 : index
    %87 = vector.load %arg8[%c0_42, %c0_43, %c0_44] : memref<1x8x256xf32, #tpu.memory_space<vmem>>, vector<1x8x256xf32>
    %88 = vector.shape_cast %87 : vector<1x8x256xf32> to vector<8x256xf32>
    %89 = vector.shape_cast %86 : vector<8x256xf32> to vector<1x8x256xf32>
    tpu.vector_store %arg8[%c0_42, %c0_43, %c0_44], %89 {strides = array<i32>} : memref<1x8x256xf32, #tpu.memory_space<vmem>>, vector<1x8x256xf32>,
    %c2_i32_45 = arith.constant 2 : i32
    %90 = arith.cmpi eq, %arg1, %c2_i32_45 : i32
    %91 = arith.extui %90 : i1 to i32
    %c0_i32_46 = arith.constant 0 : i32
    %92 = arith.cmpi ne, %91, %c0_i32_46 : i32
    scf.if %92 {
      %c0_47 = arith.constant 0 : index
      %c0_48 = arith.constant 0 : index
      %c0_49 = arith.constant 0 : index
      %93 = vector.load %arg6[%c0_47, %c0_48, %c0_49] : memref<1x8x256xf32, #tpu.memory_space<vmem>>, vector<1x8x256xf32>
      %94 = vector.shape_cast %93 : vector<1x8x256xf32> to vector<8x256xf32>
      %95 = vector.shape_cast %86 : vector<8x256xf32> to vector<1x8x256xf32>
      tpu.vector_store %arg6[%c0_47, %c0_48, %c0_49], %95 {strides = array<i32>} : memref<1x8x256xf32, #tpu.memory_space<vmem>>, vector<1x8x256xf32>,
    } else {
    }
    return
  }
  func.func @transform_0(%arg0: i32, %arg1: i32) -> (i32, i32, i32, i32) {
    %c0_i32 = arith.constant 0 : i32
    %c0_i32_0 = arith.constant 0 : i32
    %c0_i32_1 = arith.constant 0 : i32
    return %c0_i32, %arg1, %arg0, %c0_i32_0 : i32, i32, i32, i32
  }
  func.func @transform_2(%arg0: i32, %arg1: i32) -> (i32, i32, i32) {
    %c0_i32 = arith.constant 0 : i32
    %c0_i32_0 = arith.constant 0 : i32
    %c0_i32_1 = arith.constant 0 : i32
    return %c0_i32, %arg0, %c0_i32_0 : i32, i32, i32
  }
  func.func @transform_3(%arg0: i32, %arg1: i32) -> (i32, i32, i32) {
    %c0_i32 = arith.constant 0 : i32
    %c0_i32_0 = arith.constant 0 : i32
    return %arg1, %arg0, %c0_i32 : i32, i32, i32
  }
  func.func @transform_4(%arg0: i32, %arg1: i32) -> (i32, i32, i32) {
    %c0_i32 = arith.constant 0 : i32
    %c0_i32_0 = arith.constant 0 : i32
    %c0_i32_1 = arith.constant 0 : i32
    return %c0_i32, %arg0, %c0_i32_0 : i32, i32, i32
  }
}

</mosaic_0001>

<bundles_post_ra>
// kernel: tpu_custom_call.1
= control target key start
LH: loop header
LB: loop body
LE: loop exit
PB: predicated region body
PF: predicated region fallthrough
CT: control target
= control target key end

     0   :  { %10 = vsyncpa [#allocation6], 0  ;;  %s1966_s0 = inlined_call_operand.hbm [shape: f32[1,12,8,256], index: 0, kind: input, shape index: {}]   ;;  %s1967_s1 = inlined_call_operand.hbm [shape: f32[1,256,256], index: 1, kind: input, shape index: {}]   ;;  %s1968_s2 = inlined_call_operand.hbm [shape: f32[1,8,256], index: 2, kind: input, shape index: {}]   ;;  %s1969_s3 = inlined_call_operand.hbm [shape: f32[12,8,256], index: 3, kind: output, shape index: {0}]   ;;  %s1970_s4 = inlined_call_operand.hbm [shape: f32[1,8,256], index: 4, kind: output, shape index: {1}]  }
   0x1   :  { %12 = vsyncpa [#allocation6 + $0x1], 0 }
   0x2   :  { %13 = vsyncpa [#allocation9], 0 }
   0x3   :  { %14 = vsyncpa [#allocation7], 0 }
   0x4   :  { %16 = vsyncpa [#allocation7 + $0x1], 0 }
   0x5   :  { %17 = vsyncpa [#allocation12], 0  ;;  %s1480_s15 = smov 0   ;;  %s1482_s16 = smov 0  }
   0x6   :  { %s1484_s17 = smov 0   ;;  %s1486_s18 = smov 0  }
   0x7   :  { %s1488_s19 = smov 0   ;;  %s1490_s20 = smov 0  }
   0x8 LB: > { %s848_s21 = sadd.s32 4294967295, %s1444_s20   ;;  %s849_s22 = sadd.s32 4294967294, %s1444_s20   ;;  %s1444_s20 = sphi %s1490_s20, %s23_s20   ;;  %s1440_s19 = sphi %s1488_s19, %s2002_s19   ;;  %s1436_s18 = sphi %s1486_s18, %s2001_s18   ;;  %s1432_s17 = sphi %s1484_s17, %s2000_s17   ;;  %s1428_s16 = sphi %s1482_s16, %s1999_s16   ;;  %s1424_s15 = sphi %s1480_s15, %s1998_s15  }
   0x9   : > { %p51_p0 = scmp.ne.s32.totalorder %s1432_s17, %s1428_s16  ;;  %p52_p1 = scmp.eq.s32.totalorder %s1444_s20, 0 }
   0xa   : > { %p57_p2 = scmp.ne.s32.totalorder %s1428_s16, %s1424_s15  ;;  %p1518_p3 = scmp.eq.s32.totalorder %s848_s21, 0 }
   0xb   : > { %p1522_p4 = scmp.eq.s32.totalorder %s848_s21, 2  ;;  %p1526_p5 = por %p52_p1, %p51_p0 }
   0xc   : > { %s1979_s24 = scalar_select %p1518_p3, 1, 0 }
   0xd   : > { %s1980_s25 = scalar_select %p1522_p4, 1, 0 }
   0xe   : > { %p115_p6 = scmp.eq.s32.totalorder %s849_s22, 2  ;;  %p1532_p7 = por %p1518_p3, %p57_p2 }
   0xf   : > { %p1538_p8 = por %p1522_p4, %p51_p0  ;;  %p850_p10 = scmp.ge.s32.totalorder %s1444_s20, 1 }
  0x10   : > { %s1982_s27 = scalar_select %p1532_p7, 1, 0 }
  0x11   : > { %s1983_s28 = scalar_select %p1538_p8, 1, 0 }
  0x12   : > { %p1542_p9 = por %p115_p6, %p57_p2  ;;  %p148_p11 = scmp.lt.s32.totalorder %s1444_s20, 4 }
  0x13   : > { %s1446_s5 = smov [#allocation8]   ;;  %p1170_p13 = scmp.lt.s32.totalorder %s1444_s20, 3 }
  0x14   : > { %s1984_s29 = scalar_select %p1542_p9, 1, 0 }
  0x15   : > { %p1548_p12 = pnand %p850_p10, %p148_p11  ;;  %s164_s6 = sshll.u32 %s1446_s5, 4  ;;  %s165_s6 = int_to_ptr.vmem [resolvable:$true] %s164_s6 }
  0x16   : > { %p1557_p1 = pnand %p1170_p13, %p1526_p5  ;;  %s32_s9 = sadd.s32 1, %s1440_s19 }
  0x17   : > { %s1985_s30 = scalar_select %p1548_p12, 1, 0 }
  0x18   : > { %p1157_p0 = pneg %p1548_p12  ;;  %p1568_p6 = scmp.ge.s32.totalorder %s32_s9, 3 }
  0x19   : > { %s1986_s7 = scalar_select %p1557_p1, 1, 0 }
  0x1a   : > { %p1563_p2 = pnand %p1157_p0, %p1518_p3  ;;  %s175_s11 = sand.u32 1, %s1432_s17  }
  0x1b   : > { %s1988_s10 = scalar_select %p1568_p6, 1, 0 }
  0x1c   : > { %s1246_s14 = scalar_lea.hbm %s1968_s2, 256  ;;  %p1248_p10 = pneg %p1563_p2 }
  0x1d   : > { %p1247_p5 = scmp.ne.s32.totalorder %s1968_s2, %s1246_s14  ;;  %p1253_p0 = scmp.lt.u32.totalorder %s1246_s14, %s1968_s2 }
  0x1f   : > { %p1249_p11 = pnand %p1248_p10, %p1247_p5 }
  0x21   : > { %p1250_p13 = pneg %p1249_p11 }
  0x23   : > { %p1255_p9 = pnand %p1253_p0, %p1250_p13 }
  0x25   : > { %1258 = shalt.err (!%p1255_p9)
}
  0x26   : > { %s1259_s23 = scalar_lea.vmem %s165_s6, 256  ;;  %p1267_p7 = scmp.lt.s32.totalorder %s165_s6, %s165_s6 }
  0x27   : > { %p1260_p4 = scmp.ne.s32.totalorder %s165_s6, %s1259_s23  ;;  %p1268_p12 = scmp.lt.s32.totalorder %s1259_s23, %s1259_s23 }
  0x29   : > { %p1262_p8 = pnand %p1260_p4, %p1248_p10  ;;  %p1269_p1 = por %p1268_p12, %p1267_p7 }
  0x2b   : > { %p1263_p3 = pneg %p1262_p8 }
  0x2d   : > { %p1270_p6 = pnand %p1269_p1, %p1263_p3 }
  0x2f   : > { %1273 = shalt.err (!%p1270_p6)
}
  0x30   : > { %1160 = dma.hbm_to_vmem [thread:$0]  (!%p1563_p2), %s1968_s2, 256, %s165_s6, [#allocation9]  }
  0x31   : > { %p1989_p4 = scmp.ne.s32.totalorder %s1988_s10, 0  ;;  %s853_s23 = sshll.u32 %s175_s11, 6 }
  0x32   : > { %s886_s21 = sshll.u32 %s1440_s19, 10  ;;  %s179_s5 = scalar_lea.vmem [#allocation5], %s853_s23 }
  0x33   : > { %s2004_s9 = smov (%p1989_p4, %s32_s9), 0  ;;  %s1599_s26 = scalar_lea.hbm %s1966_s0, %s886_s21 }
  0x34   : > { %s39_s14 = ssub.s32 %s1440_s19, %s2004_s9  ;;  %s189_s12 = sshll.u32 %s179_s5, 4  ;;  %s1606_s12 = int_to_ptr.vmem [resolvable:$true] %s189_s12 }
  0x35   : > { %p42_p3 = scmp.eq.s32.totalorder %s39_s14, 0  ;;  %s1990_s6 = sadd.s32 1, %s1432_s17 }
  0x36   : > { %s1608_s13 = scalar_lea.sflag [#allocation6], %s175_s11  ;;  %s1274_s14 = scalar_lea.hbm %s1599_s26, 1024 }
  0x37   : > { %s1604_s10 = scalar_select %p42_p3, %s1432_s17, %s1990_s6  }
  0x38   : > { %p1275_p7 = scmp.ne.s32.totalorder %s1599_s26, %s1274_s14  ;;  %p1991_p8 = scmp.ne.s32.totalorder %s1986_s7, 0 }
  0x39   : > { %s1279_s23 = scalar_lea.hbm %s1966_s0, 3072  ;;  %p1280_p2 = scmp.lt.u32.totalorder %s1599_s26, %s1966_s0 }
  0x3a   : > { %p1276_p9 = pneg %p1991_p8  ;;  %p1281_p6 = scmp.lt.u32.totalorder %s1279_s23, %s1274_s14 }
  0x3b   : > { %p1283_p10 = scmp.lt.u32.totalorder %s1274_s14, %s1599_s26 }
  0x3c   : > { %p1277_p12 = pnand %p1276_p9, %p1275_p7  ;;  %p1282_p5 = por %p1281_p6, %p1280_p2 }
  0x3e   : > { %p1278_p1 = pneg %p1277_p12  ;;  %p1284_p11 = por %p1283_p10, %p1282_p5 }
  0x40   : > { %p1285_p13 = pnand %p1284_p11, %p1278_p1 }
  0x42   : > { %1288 = shalt.err (!%p1285_p13)
}
  0x43   : > { %s1289_s11 = scalar_lea.vmem %s1606_s12, 1024  ;;  %s1447_s6 = smov [#allocation5]  }
  0x44   : > { %p1290_p0 = scmp.ne.s32.totalorder %s1606_s12, %s1289_s11  ;;  %s1294_s21 = sshll.u32 %s1447_s6, 4  ;;  %s1295_s21 = int_to_ptr.vmem [resolvable:$false] %s1294_s21 }
  0x45   : > { %s1296_s8 = scalar_lea.vmem %s1295_s21, 2048  ;;  %p1297_p7 = scmp.lt.s32.totalorder %s1606_s12, %s1295_s21 }
  0x46   : > { %p1292_p4 = pnand %p1290_p0, %p1276_p9  ;;  %p1298_p12 = scmp.lt.s32.totalorder %s1296_s8, %s1289_s11 }
  0x48   : > { %p1293_p3 = pneg %p1292_p4  ;;  %p1299_p2 = por %p1298_p12, %p1297_p7 }
  0x4a   : > { %p1300_p6 = pnand %p1299_p2, %p1293_p3 }
  0x4c   : > { %1303 = shalt.err (!%p1300_p6)
}
  0x4d   : > { %s1448_s14 = smov 256   ;;  %s1449_s23 = smov 16  }
  0x4e   : > { %1164 = dma.hbm_to_vmem [thread:$0]  (!%p1991_p8), %s1599_s26, 1024, %s1606_s12, %s1608_s13, %s1448_s14, %s1448_s14, %s1449_s23  }
  0x4f   : > { %p1992_p9 = scmp.ne.s32.totalorder %s1985_s30, 0 }
  0x50   : > { %s1639_s22 = sand.u32 (!%p1992_p9), 1, %s1428_s16   ;;  %p1993_p1 = scmp.ne.s32.totalorder (!%p1992_p9), %s1982_s27, 0 }
  0x51   : > { %201 = sbr.rel (%p1992_p9) target bundleno = 1160 (0x488), region = 28  ;;  %s858_s5 = sshll.u32 (!%p1992_p9), %s1639_s22, 6 }
  0x52   : > { %s204_s11 = scalar_lea.sflag (!%p1992_p9), [#allocation6], %s1639_s22  ;;  %s1643_s6 = scalar_lea.vmem (!%p1992_p9), [#allocation5], %s858_s5 }
  0x58   : > { %1405 = dma.done.wait (%p1993_p1), %s204_s11, 1024  }
  0x59   : > { %1407 = vsyncadd (%p1993_p1), %s204_s11, 4294966272  ;;  %p1994_p8 = scmp.ne.s32.totalorder %s1979_s24, 0 }
  0x5b   : > { %1409 = dma.done.wait (%p1994_p8), [#allocation9], 256  }
  0x5c   : > { %1411 = vsyncadd (%p1994_p8), [#allocation9], 4294967040  ;;  %s1653_s30 = scalar_lea.vmem [#allocation10], %s858_s5  ;;  %p861_p5 = scmp.ne.s32.totalorder %s1436_s18, 0 }
  0x5d   : > { %v251_v0 = vld [vmem:[#allocation8] sm:$0xff] (!%p861_p5)  ;;  %v252_v1 = vld [vmem:[#allocation8 + $0x8] sm:$0xff] (!%p861_p5)  ;;  %s1450_s7 = smov (!%p861_p5), [#allocation2]   ;;  %s1304_s13 = scalar_lea.hbm (!%p861_p5), %s1967_s1, 8192 }
  0x5e   : > { %239 = sbr.rel (%p861_p5) target bundleno = 113 (0x71), region = 40  ;;  %s247_s26 = sshll.u32 (!%p861_p5), %s1450_s7, 4  ;;  %253 = vst [vmem:[#allocation3] sm:$0xff] (!%p861_p5), %v251_v0  ;;  %254 = vst [vmem:[#allocation3 + $0x8] sm:$0xff] (!%p861_p5), %v252_v1  ;;  %s248_s26 = int_to_ptr.vmem [resolvable:$true] %s247_s26 }
  0x5f   : > { %p1305_p10 = scmp.ne.s32.totalorder (!%p861_p5), %s1967_s1, %s1304_s13  ;;  %p1308_p11 = scmp.lt.u32.totalorder (!%p861_p5), %s1304_s13, %s1967_s1 }
  0x61   : > { %p1310_p13 = pnand (!%p861_p5), %p1308_p11, %p1305_p10 }
  0x65   : > { %1313 = shalt.err (!%p1310_p13)  }
  0x66   : > { %s1314_s23 = scalar_lea.vmem %s248_s26, 8192  ;;  %p1319_p4 = scmp.lt.s32.totalorder %s248_s26, %s248_s26 }
  0x67   : > { %p1315_p0 = scmp.ne.s32.totalorder %s248_s26, %s1314_s23  ;;  %p1320_p3 = scmp.lt.s32.totalorder %s1314_s23, %s1314_s23 }
  0x69   : > { %p1321_p7 = por %p1320_p3, %p1319_p4 }
  0x6b   : > { %p1322_p12 = pnand %p1321_p7, %p1315_p0 }
  0x6d   : > { %1325 = shalt.err (!%p1322_p12)  }
  0x6e   : > { %250 = dma.hbm_to_vmem [thread:$0]  %s1967_s1, 8192, %s248_s26, [#allocation4] }
  0x6f   : > { %1412 = dma.done.wait [#allocation4], 8192 }
  0x70   : > { %1413 = vsyncadd [#allocation4], 4294959104 }
  0x71 PF: > { %v260_v2 = vld [vmem:[#allocation2 + $0x8] sm:$0xff]  ;;  %v262_v3 = vld [vmem:[#allocation2 + $0x18] sm:$0xff]  ;;  %v259_v4 = vld [vmem:[#allocation2] sm:$0xff]  ;;  %s1835_s7 = sshll.u32 %s1436_s18, 2  ;;  %p875_p8 = scmp.ne.s32.totalorder %s1436_s18, 2 }
  0x72   : > { %v1668_v5 = vpack.c.bf16 %v262_v3, %v260_v2  ;;  %v261_v6 = vld [vmem:[#allocation2 + $0x10] sm:$0xff]  ;;  %v264_v7 = vld [vmem:[#allocation2 + $0x28] sm:$0xff]  ;;  %v266_v8 = vld [vmem:[#allocation2 + $0x38] sm:$0xff]  ;;  %p409_p2 = scmp.lt.s32.totalorder %s1835_s7, 11  ;;  %s415_s27 = sadd.s32 1, %s1835_s7 }
  0x73   : > { %v1670_v9 = vpack.c.bf16 %v261_v6, %v259_v4  ;;  %v1672_v10 = vpack.c.bf16 %v266_v8, %v264_v7  ;;  %v263_v11 = vld [vmem:[#allocation2 + $0x20] sm:$0xff]  ;;  %v265_v12 = vld [vmem:[#allocation2 + $0x30] sm:$0xff]  ;;  %v268_v13 = vld [vmem:[#allocation2 + $0x48] sm:$0xff]  ;;  %p501_p6 = scmp.lt.s32.totalorder %s415_s27, 11  ;;  %s507_s13 = sadd.s32 2, %s1835_s7 }
  0x74   : > { %890 = vmatprep.subr.bf16.mxu0 %v1668_v5  ;;  %v270_v14 = vld [vmem:[#allocation2 + $0x58] sm:$0xff]  ;;  %954 = vmatprep.subr.bf16.mxu1 %v1668_v5  ;;  %v1677_v15 = vpack.c.bf16 %v265_v12, %v263_v11  ;;  %v267_v17 = vld [vmem:[#allocation2 + $0x40] sm:$0xff]  ;;  %v269_v18 = vld [vmem:[#allocation2 + $0x50] sm:$0xff]  ;;  %s410_s26 = scalar_select %p409_p2, 1, 0 }
  0x75   : > { %892 = vmatpush1.bf16.msra.mxu0 %v1670_v9  ;;  %956 = vmatpush1.bf16.msra.mxu1 %v1670_v9  ;;  %v1681_v16 = vpack.c.bf16 %v270_v14, %v268_v13  ;;  %v272_v19 = vld [vmem:[#allocation2 + $0x68] sm:$0xff]  ;;  %v274_v20 = vld [vmem:[#allocation2 + $0x78] sm:$0xff]  ;;  %v1685_v21 = vpack.c.bf16 %v269_v18, %v267_v17  ;;  %v271_v23 = vld [vmem:[#allocation2 + $0x60] sm:$0xff]  ;;  %s502_s12 = scalar_select %p501_p6, 1, 0 }
  0x76   : > { %894 = vmatprep.subr.bf16.mxu0 %v1672_v10  ;;  %958 = vmatprep.subr.bf16.mxu1 %v1672_v10  ;;  %v1689_v22 = vpack.c.bf16 %v274_v20, %v272_v19  ;;  %v273_v24 = vld [vmem:[#allocation2 + $0x70] sm:$0xff]  ;;  %v276_v25 = vld [vmem:[#allocation2 + $0x88] sm:$0xff]  ;;  %v278_v26 = vld [vmem:[#allocation2 + $0x98] sm:$0xff]  ;;  %p593_p9 = scmp.lt.s32.totalorder %s507_s13, 11  ;;  %s599_s8 = sadd.s32 3, %s1835_s7 }
  0x77   : > { %v1693_v27 = vpack.c.bf16 %v273_v24, %v271_v23  ;;  %v1697_v28 = vpack.c.bf16 %v278_v26, %v276_v25  ;;  %v275_v29 = vld [vmem:[#allocation2 + $0x80] sm:$0xff]  ;;  %v277_v30 = vld [vmem:[#allocation2 + $0x90] sm:$0xff]  ;;  %v280_v31 = vld [vmem:[#allocation2 + $0xa8] sm:$0xff]  ;;  %p685_p1 = scmp.lt.s32.totalorder %s599_s8, 11 }
  0x78   : > { %v282_v32 = vld [vmem:[#allocation2 + $0xb8] sm:$0xff]  ;;  %v1701_v33 = vpack.c.bf16 %v277_v30, %v275_v29  ;;  %v279_v35 = vld [vmem:[#allocation2 + $0xa0] sm:$0xff]  ;;  %v281_v36 = vld [vmem:[#allocation2 + $0xb0] sm:$0xff]  ;;  %s594_s21 = scalar_select %p593_p9, 1, 0 }
  0x79   : > { %896 = vmatpush1.bf16.msra.mxu0 %v1677_v15  ;;  %960 = vmatpush1.bf16.msra.mxu1 %v1677_v15  ;;  %v1705_v34 = vpack.c.bf16 %v282_v32, %v280_v31  ;;  %v284_v37 = vld [vmem:[#allocation2 + $0xc8] sm:$0xff]  ;;  %v286_v38 = vld [vmem:[#allocation2 + $0xd8] sm:$0xff]  ;;  %v1709_v39 = vpack.c.bf16 %v281_v36, %v279_v35  ;;  %v283_v41 = vld [vmem:[#allocation2 + $0xc0] sm:$0xff]  ;;  %s686_s24 = scalar_select %p685_p1, 1, 0 }
  0x7a   : > { %898 = vmatprep.subr.bf16.mxu0 %v1681_v16  ;;  %962 = vmatprep.subr.bf16.mxu1 %v1681_v16  ;;  %v1713_v40 = vpack.c.bf16 %v286_v38, %v284_v37  ;;  %v285_v42 = vld [vmem:[#allocation2 + $0xd0] sm:$0xff]  ;;  %v1715_v43 = vld [vmem:[#allocation3 + $0x8] sm:$0xff]  ;;  %v290_v45 = vld [vmem:[#allocation2 + $0xf8] sm:$0xff] }
  0x7b   : > { %v288_v44 = vld [vmem:[#allocation2 + $0xe8] sm:$0xff]  ;;  %392 = vmatprep.mubr.f32.mxu0 %v1715_v43  ;;  %v1720_v46 = vpack.c.bf16 %v285_v42, %v283_v41  ;;  %v287_v48 = vld [vmem:[#allocation2 + $0xe0] sm:$0xff]  ;;  %v289_v49 = vld [vmem:[#allocation2 + $0xf0] sm:$0xff] }
  0x7c   : > { %v1724_v47 = vpack.c.bf16 %v290_v45, %v288_v44  ;;  %v292_v50 = vld [vmem:[#allocation2 + $0x108] sm:$0xff]  ;;  %v294_v51 = vld [vmem:[#allocation2 + $0x118] sm:$0xff]  ;;  %v1728_v52 = vpack.c.bf16 %v289_v49, %v287_v48  ;;  %v291_v54 = vld [vmem:[#allocation2 + $0x100] sm:$0xff] }
  0x7d   : > { %900 = vmatpush1.bf16.msra.mxu0 %v1685_v21  ;;  %964 = vmatpush1.bf16.msra.mxu1 %v1685_v21  ;;  %v1732_v53 = vpack.c.bf16 %v294_v51, %v292_v50  ;;  %v293_v55 = vld [vmem:[#allocation2 + $0x110] sm:$0xff]  ;;  %v296_v56 = vld [vmem:[#allocation2 + $0x128] sm:$0xff]  ;;  %v298_v57 = vld [vmem:[#allocation2 + $0x138] sm:$0xff] }
  0x7e   : > { %902 = vmatprep.subr.bf16.mxu0 %v1689_v22  ;;  %966 = vmatprep.subr.bf16.mxu1 %v1689_v22  ;;  %v1736_v58 = vpack.c.bf16 %v293_v55, %v291_v54  ;;  %v1740_v59 = vpack.c.bf16 %v298_v57, %v296_v56  ;;  %v295_v60 = vld [vmem:[#allocation2 + $0x120] sm:$0xff]  ;;  %v297_v61 = vld [vmem:[#allocation2 + $0x130] sm:$0xff]  ;;  %v300_v62 = vld [vmem:[#allocation2 + $0x148] sm:$0xff] }
  0x7f   : > { %v302_v63 = vld [vmem:[#allocation2 + $0x158] sm:$0xff]  ;;  %v1744_v0 = vpack.c.bf16 %v297_v61, %v295_v60  ;;  %v299_v2 = vld [vmem:[#allocation2 + $0x140] sm:$0xff]  ;;  %v301_v3 = vld [vmem:[#allocation2 + $0x150] sm:$0xff] }
  0x80   : > { %v1748_v1 = vpack.c.bf16 %v302_v63, %v300_v62  ;;  %v304_v4 = vld [vmem:[#allocation2 + $0x168] sm:$0xff]  ;;  %v306_v6 = vld [vmem:[#allocation2 + $0x178] sm:$0xff]  ;;  %v1752_v7 = vpack.c.bf16 %v301_v3, %v299_v2  ;;  %v303_v11 = vld [vmem:[#allocation2 + $0x160] sm:$0xff]  ;;  %v400_v63 = vmul.f32 0.5, %v1715_v43  ;;  %v411_v2 = vstv %s410_s26 }
  0x81   : > { %904 = vmatpush1.bf16.msra.mxu0 %v1693_v27  ;;  %968 = vmatpush1.bf16.msra.mxu1 %v1693_v27  ;;  %v1756_v8 = vpack.c.bf16 %v306_v6, %v304_v4  ;;  %v305_v12 = vld [vmem:[#allocation2 + $0x170] sm:$0xff]  ;;  %v308_v13 = vld [vmem:[#allocation2 + $0x188] sm:$0xff]  ;;  %v310_v14 = vld [vmem:[#allocation2 + $0x198] sm:$0xff]  ;;  %vm412_vm0 = vcmp.eq.s32.totalorder %v411_v2, 1 }
  0x82   : > { %906 = vmatprep.subr.bf16.mxu0 %v1697_v28  ;;  %970 = vmatprep.subr.bf16.mxu1 %v1697_v28  ;;  %v1760_v17 = vpack.c.bf16 %v305_v12, %v303_v11  ;;  %v1764_v18 = vpack.c.bf16 %v310_v14, %v308_v13  ;;  %v307_v19 = vld [vmem:[#allocation2 + $0x180] sm:$0xff]  ;;  %v309_v20 = vld [vmem:[#allocation2 + $0x190] sm:$0xff]  ;;  %v312_v23 = vld [vmem:[#allocation2 + $0x1a8] sm:$0xff] }
  0x83   : > { %v314_v24 = vld [vmem:[#allocation2 + $0x1b8] sm:$0xff]  ;;  %v1768_v25 = vpack.c.bf16 %v309_v20, %v307_v19  ;;  %v311_v29 = vld [vmem:[#allocation2 + $0x1a0] sm:$0xff]  ;;  %v313_v30 = vld [vmem:[#allocation2 + $0x1b0] sm:$0xff] }
  0x84   : > { %v1772_v26 = vpack.c.bf16 %v314_v24, %v312_v23  ;;  %v316_v31 = vld [vmem:[#allocation2 + $0x1c8] sm:$0xff]  ;;  %v318_v32 = vld [vmem:[#allocation2 + $0x1d8] sm:$0xff]  ;;  %v1776_v35 = vpack.c.bf16 %v313_v30, %v311_v29  ;;  %v315_v37 = vld [vmem:[#allocation2 + $0x1c0] sm:$0xff] }
  0x85   : > { %908 = vmatpush1.bf16.msra.mxu0 %v1701_v33  ;;  %972 = vmatpush1.bf16.msra.mxu1 %v1701_v33  ;;  %v1780_v36 = vpack.c.bf16 %v318_v32, %v316_v31  ;;  %v317_v38 = vld [vmem:[#allocation2 + $0x1d0] sm:$0xff]  ;;  %v320_v41 = vld [vmem:[#allocation2 + $0x1e8] sm:$0xff]  ;;  %v322_v42 = vld [vmem:[#allocation2 + $0x1f8] sm:$0xff] }
  0x86   : > { %910 = vmatprep.subr.bf16.mxu0 %v1705_v34  ;;  %974 = vmatprep.subr.bf16.mxu1 %v1705_v34  ;;  %v1784_v44 = vpack.c.bf16 %v317_v38, %v315_v37  ;;  %v1788_v45 = vpack.c.bf16 %v322_v42, %v320_v41  ;;  %v319_v48 = vld [vmem:[#allocation2 + $0x1e0] sm:$0xff]  ;;  %v321_v49 = vld [vmem:[#allocation2 + $0x1f0] sm:$0xff]  ;;  %v327_v54 = vld [vmem:[%s1643_s6 + $0x8] sm:$0xff]  ;;  %v687_v42 = vstv %s686_s24 }
  0x87   : > { %v1792_v50 = vpack.c.bf16 %v321_v49, %v319_v48  ;;  %v323_v51 = vld [vmem:[#allocation3] sm:$0xff]  ;;  %vm688_vm3 = vcmp.eq.s32.totalorder %v687_v42, 1 }
  0x88   : > { %v399_v61 = vmul.f32 0.5, %v323_v51  ;;  %v871_v32 = vld [vmem:[%s1643_s6 + $0x30] sm:$0xff] }
  0x89   : > { %912 = vmatpush1.bf16.msra.mxu0 %v1709_v39  ;;  %976 = vmatpush1.bf16.msra.mxu1 %v1709_v39 }
  0x8a   : > { %914 = vmatprep.subr.bf16.mxu0 %v1713_v40  ;;  %978 = vmatprep.subr.bf16.mxu1 %v1713_v40 }
  0x8d   : > { %916 = vmatpush1.bf16.msra.mxu0 %v1720_v46  ;;  %980 = vmatpush1.bf16.msra.mxu1 %v1720_v46 }
  0x8e   : > { %918 = vmatprep.subr.bf16.mxu0 %v1724_v47  ;;  %982 = vmatprep.subr.bf16.mxu1 %v1724_v47 }
  0x91   : > { %920 = vmatpush1.bf16.msra.mxu0 %v1728_v52  ;;  %984 = vmatpush1.bf16.msra.mxu1 %v1728_v52 }
  0x92   : > { %922 = vmatprep.subr.bf16.mxu0 %v1732_v53  ;;  %986 = vmatprep.subr.bf16.mxu1 %v1732_v53 }
  0x95   : > { %924 = vmatpush1.bf16.msra.mxu0 %v1736_v58  ;;  %988 = vmatpush1.bf16.msra.mxu1 %v1736_v58 }
  0x96   : > { %926 = vmatprep.subr.bf16.mxu0 %v1740_v59  ;;  %990 = vmatprep.subr.bf16.mxu1 %v1740_v59 }
  0x99   : > { %928 = vmatpush1.bf16.msra.mxu0 %v1744_v0  ;;  %992 = vmatpush1.bf16.msra.mxu1 %v1744_v0 }
  0x9a   : > { %930 = vmatprep.subr.bf16.mxu0 %v1748_v1  ;;  %994 = vmatprep.subr.bf16.mxu1 %v1748_v1 }
  0x9d   : > { %932 = vmatpush1.bf16.msra.mxu0 %v1752_v7  ;;  %996 = vmatpush1.bf16.msra.mxu1 %v1752_v7 }
  0x9e   : > { %934 = vmatprep.subr.bf16.mxu0 %v1756_v8  ;;  %998 = vmatprep.subr.bf16.mxu1 %v1756_v8 }
  0xa1   : > { %936 = vmatpush1.bf16.msra.mxu0 %v1760_v17  ;;  %1000 = vmatpush1.bf16.msra.mxu1 %v1760_v17 }
  0xa2   : > { %938 = vmatprep.subr.bf16.mxu0 %v1764_v18  ;;  %1002 = vmatprep.subr.bf16.mxu1 %v1764_v18 }
  0xa5   : > { %940 = vmatpush1.bf16.msra.mxu0 %v1768_v25  ;;  %1004 = vmatpush1.bf16.msra.mxu1 %v1768_v25 }
  0xa6   : > { %942 = vmatprep.subr.bf16.mxu0 %v1772_v26  ;;  %1006 = vmatprep.subr.bf16.mxu1 %v1772_v26 }
  0xa9   : > { %944 = vmatpush1.bf16.msra.mxu0 %v1776_v35  ;;  %1008 = vmatpush1.bf16.msra.mxu1 %v1776_v35 }
  0xaa   : > { %946 = vmatprep.subr.bf16.mxu0 %v1780_v36  ;;  %1010 = vmatprep.subr.bf16.mxu1 %v1780_v36 }
  0xad   : > { %948 = vmatpush1.bf16.msra.mxu0 %v1784_v44  ;;  %1012 = vmatpush1.bf16.msra.mxu1 %v1784_v44 }
  0xae   : > { %950 = vmatprep.subr.bf16.mxu0 %v1788_v45  ;;  %1014 = vmatprep.subr.bf16.mxu1 %v1788_v45 }
  0xb1   : > { %952 = vmatpush1.bf16.msra.mxu0 %v1792_v50  ;;  %1016 = vmatpush1.bf16.msra.mxu1 %v1792_v50 }
  0xb2   : > { %1018 = vmatprep.subr.bf16.mxu0 %v1668_v5  ;;  %1082 = vmatprep.subr.bf16.mxu1 %v1668_v5  ;;  %v326_v5 = vld [vmem:[%s1643_s6] sm:$0xff] }
  0xb4   : > { %393 = vmatmul.mubr.f32.vlgmr.msra.gmra.mrb[0].mxu0 %v323_v51 }
  0xb5   : > { %1020 = vmatpush1.bf16.msra.mxu0 %v1670_v9 }
  0xb6   : > { %1022 = vmatprep.subr.bf16.mxu0 %v1672_v10 }
  0xb9   : > { %1024 = vmatpush1.bf16.msra.mxu0 %v1677_v15 }
  0xba   : > { %1026 = vmatprep.subr.bf16.mxu0 %v1681_v16 }
  0xbd   : > { %1028 = vmatpush1.bf16.msra.mxu0 %v1685_v21 }
  0xbe   : > { %1030 = vmatprep.subr.bf16.mxu0 %v1689_v22 }
  0xc1   : > { %1032 = vmatpush1.bf16.msra.mxu0 %v1693_v27 }
  0xc2   : > { %1034 = vmatprep.subr.bf16.mxu0 %v1697_v28 }
  0xc5   : > { %1036 = vmatpush1.bf16.msra.mxu0 %v1701_v33 }
  0xc6   : > { %1038 = vmatprep.subr.bf16.mxu0 %v1705_v34 }
  0xc9   : > { %1040 = vmatpush1.bf16.msra.mxu0 %v1709_v39 }
  0xca   : > { %1042 = vmatprep.subr.bf16.mxu0 %v1713_v40 }
  0xcd   : > { %1044 = vmatpush1.bf16.msra.mxu0 %v1720_v46 }
  0xce   : > { %1046 = vmatprep.subr.bf16.mxu0 %v1724_v47 }
  0xd1   : > { %1048 = vmatpush1.bf16.msra.mxu0 %v1728_v52 }
  0xd2   : > { %1050 = vmatprep.subr.bf16.mxu0 %v1732_v53 }
  0xd5   : > { %1052 = vmatpush1.bf16.msra.mxu0 %v1736_v58 }
  0xd6   : > { %1054 = vmatprep.subr.bf16.mxu0 %v1740_v59 }
  0xd9   : > { %1056 = vmatpush1.bf16.msra.mxu0 %v1744_v0 }
  0xda   : > { %1058 = vmatprep.subr.bf16.mxu0 %v1748_v1 }
  0xdd   : > { %1060 = vmatpush1.bf16.msra.mxu0 %v1752_v7 }
  0xde   : > { %1062 = vmatprep.subr.bf16.mxu0 %v1756_v8 }
  0xe1   : > { %1064 = vmatpush1.bf16.msra.mxu0 %v1760_v17 }
  0xe2   : > { %1066 = vmatprep.subr.bf16.mxu0 %v1764_v18 }
  0xe5   : > { %1068 = vmatpush1.bf16.msra.mxu0 %v1768_v25 }
  0xe6   : > { %1070 = vmatprep.subr.bf16.mxu0 %v1772_v26 }
  0xe9   : > { %1072 = vmatpush1.bf16.msra.mxu0 %v1776_v35 }
  0xea   : > { %1074 = vmatprep.subr.bf16.mxu0 %v1780_v36 }
  0xed   : > { %1076 = vmatpush1.bf16.msra.mxu0 %v1784_v44 }
  0xee   : > { %1078 = vmatprep.subr.bf16.mxu0 %v1788_v45 }
  0xf1   : > { %1080 = vmatpush1.bf16.msra.mxu0 %v1792_v50 }
 0x187   : > { %v394_v55 = vpop.f32.mrb[0].mxu0 }
 0x188   : > { %v395_v56 = vadd.f32 %v394_v55, %v326_v5  ;;  %v396_v57 = vpop.f32.mrb[1].mxu0 }
 0x189   : > { %v397_v60 = vadd.f32 %v396_v57, %v327_v54 }
 0x18a   : > { %1230 = vtanh.f32 %v395_v56 }
 0x18b   : > { %1232 = vtanh.f32 %v397_v60 }
 0x194   : > { %v1231_v62 = vpop.eup %1230 }
 0x195   : > { %v1233_v3 = vpop.eup %1232  ;;  %v403_v4 = vmul.f32 0.5, %v1231_v62 }
 0x196   : > { %v404_v6 = vmul.f32 0.5, %v1233_v3 }
 0x197   : > { %v405_v11 = vadd.f32 %v403_v4, %v399_v61 }
 0x198   : > { %v406_v12 = vadd.f32 %v404_v6, %v400_v63 }
 0x199   : > { %407 = vst [vmem:[%s1653_s30] sm:$0xff] %v405_v11  ;;  %v413_v14 = vsel %vm412_vm0, %v405_v11, %v323_v51 }
 0x19a   : > { %408 = vst [vmem:[%s1653_s30 + $0x8] sm:$0xff] %v406_v12  ;;  %v414_v13 = vsel %vm412_vm0, %v406_v12, %v1715_v43 }
 0x19b   : > { %483 = vmatprep.mubr.f32.mxu1 %v414_v13 }
 0x19c   : > { %484 = vmatmul.mubr.f32.vlgmr.msra.gmra.mrb[0].mxu1 %v413_v14 }
 0x19d   : > { %1084 = vmatpush1.bf16.msra.mxu1 %v1670_v9  ;;  %v863_v9 = vld [vmem:[%s1643_s6 + $0x10] sm:$0xff] }
 0x19e   : > { %1086 = vmatprep.subr.bf16.mxu1 %v1672_v10  ;;  %v864_v10 = vld [vmem:[%s1643_s6 + $0x18] sm:$0xff] }
 0x1a1   : > { %1088 = vmatpush1.bf16.msra.mxu1 %v1677_v15 }
 0x1a2   : > { %1090 = vmatprep.subr.bf16.mxu1 %v1681_v16 }
 0x1a5   : > { %1092 = vmatpush1.bf16.msra.mxu1 %v1685_v21 }
 0x1a6   : > { %1094 = vmatprep.subr.bf16.mxu1 %v1689_v22 }
 0x1a9   : > { %1096 = vmatpush1.bf16.msra.mxu1 %v1693_v27 }
 0x1aa   : > { %1098 = vmatprep.subr.bf16.mxu1 %v1697_v28  ;;  %v503_v28 = vstv %s502_s12 }
 0x1ab   : > { %vm504_vm1 = vcmp.eq.s32.totalorder %v503_v28, 1 }
 0x1ad   : > { %1100 = vmatpush1.bf16.msra.mxu1 %v1701_v33 }
 0x1ae   : > { %1102 = vmatprep.subr.bf16.mxu1 %v1705_v34  ;;  %v490_v34 = vmul.f32 0.5, %v413_v14 }
 0x1b1   : > { %1104 = vmatpush1.bf16.msra.mxu1 %v1709_v39 }
 0x1b2   : > { %1106 = vmatprep.subr.bf16.mxu1 %v1713_v40  ;;  %v491_v40 = vmul.f32 0.5, %v414_v13 }
 0x1b5   : > { %1108 = vmatpush1.bf16.msra.mxu1 %v1720_v46 }
 0x1b6   : > { %1110 = vmatprep.subr.bf16.mxu1 %v1724_v47 }
 0x1b9   : > { %1112 = vmatpush1.bf16.msra.mxu1 %v1728_v52 }
 0x1ba   : > { %1114 = vmatprep.subr.bf16.mxu1 %v1732_v53 }
 0x1bd   : > { %1116 = vmatpush1.bf16.msra.mxu1 %v1736_v58  ;;  %v867_v58 = vld [vmem:[%s1643_s6 + $0x20] sm:$0xff] }
 0x1be   : > { %1118 = vmatprep.subr.bf16.mxu1 %v1740_v59  ;;  %v868_v59 = vld [vmem:[%s1643_s6 + $0x28] sm:$0xff] }
 0x1c1   : > { %1120 = vmatpush1.bf16.msra.mxu1 %v1744_v0 }
 0x1c2   : > { %1122 = vmatprep.subr.bf16.mxu1 %v1748_v1 }
 0x1c5   : > { %1124 = vmatpush1.bf16.msra.mxu1 %v1752_v7 }
 0x1c6   : > { %1126 = vmatprep.subr.bf16.mxu1 %v1756_v8 }
 0x1c9   : > { %1128 = vmatpush1.bf16.msra.mxu1 %v1760_v17 }
 0x1ca   : > { %1130 = vmatprep.subr.bf16.mxu1 %v1764_v18  ;;  %v595_v18 = vstv %s594_s21 }
 0x1cb   : > { %vm596_vm2 = vcmp.eq.s32.totalorder %v595_v18, 1 }
 0x1cd   : > { %1132 = vmatpush1.bf16.msra.mxu1 %v1768_v25 }
 0x1ce   : > { %1134 = vmatprep.subr.bf16.mxu1 %v1772_v26 }
 0x1d1   : > { %1136 = vmatpush1.bf16.msra.mxu1 %v1776_v35  ;;  %v872_v35 = vld [vmem:[%s1643_s6 + $0x38] sm:$0xff] }
 0x1d2   : > { %1138 = vmatprep.subr.bf16.mxu1 %v1780_v36 }
 0x1d5   : > { %1140 = vmatpush1.bf16.msra.mxu1 %v1784_v44 }
 0x1d6   : > { %1142 = vmatprep.subr.bf16.mxu1 %v1788_v45 }
 0x1d9   : > { %1144 = vmatpush1.bf16.msra.mxu1 %v1792_v50 }
 0x26f   : > { %v485_v15 = vpop.f32.mrb[0].mxu1 }
 0x270   : > { %v486_v16 = vadd.f32 %v863_v9, %v485_v15  ;;  %v487_v21 = vpop.f32.mrb[1].mxu1 }
 0x271   : > { %v488_v22 = vadd.f32 %v864_v10, %v487_v21 }
 0x272   : > { %1234 = vtanh.f32 %v486_v16 }
 0x273   : > { %1236 = vtanh.f32 %v488_v22 }
 0x27c   : > { %v1235_v27 = vpop.eup %1234 }
 0x27d   : > { %v1237_v33 = vpop.eup %1236  ;;  %v494_v39 = vmul.f32 0.5, %v1235_v27 }
 0x27e   : > { %v495_v43 = vmul.f32 0.5, %v1237_v33 }
 0x27f   : > { %v496_v46 = vadd.f32 %v494_v39, %v490_v34 }
 0x280   : > { %v497_v47 = vadd.f32 %v495_v43, %v491_v40 }
 0x281   : > { %865 = vst [vmem:[%s1653_s30 + $0x10] sm:$0xff] %v496_v46  ;;  %v505_v53 = vsel %vm504_vm1, %v496_v46, %v413_v14 }
 0x282   : > { %866 = vst [vmem:[%s1653_s30 + $0x18] sm:$0xff] %v497_v47  ;;  %v506_v52 = vsel %vm504_vm1, %v497_v47, %v414_v13  ;;  %v582_v20 = vmul.f32 0.5, %v505_v53 }
 0x283   : > { %575 = vmatprep.mubr.f32.mxu0 %v506_v52  ;;  %v583_v24 = vmul.f32 0.5, %v506_v52 }
 0x284   : > { %576 = vmatmul.mubr.f32.vlgmr.msra.gmra.mrb[2].mxu0 %v505_v53 }
 0x357   : > { %v577_v0 = vpop.f32.mrb[2].mxu0 }
 0x358   : > { %v578_v1 = vadd.f32 %v867_v58, %v577_v0  ;;  %v579_v7 = vpop.f32.mrb[3].mxu0 }
 0x359   : > { %v580_v8 = vadd.f32 %v868_v59, %v579_v7 }
 0x35a   : > { %1238 = vtanh.f32 %v578_v1 }
 0x35b   : > { %1240 = vtanh.f32 %v580_v8 }
 0x364   : > { %v1239_v17 = vpop.eup %1238 }
 0x365   : > { %v1241_v19 = vpop.eup %1240  ;;  %v586_v23 = vmul.f32 0.5, %v1239_v17 }
 0x366   : > { %v587_v25 = vmul.f32 0.5, %v1241_v19 }
 0x367   : > { %v588_v26 = vadd.f32 %v586_v23, %v582_v20 }
 0x368   : > { %v589_v29 = vadd.f32 %v587_v25, %v583_v24 }
 0x369   : > { %869 = vst [vmem:[%s1653_s30 + $0x20] sm:$0xff] %v588_v26  ;;  %v597_v31 = vsel %vm596_vm2, %v588_v26, %v505_v53 }
 0x36a   : > { %870 = vst [vmem:[%s1653_s30 + $0x28] sm:$0xff] %v589_v29  ;;  %v598_v30 = vsel %vm596_vm2, %v589_v29, %v506_v52  ;;  %v674_v48 = vmul.f32 0.5, %v597_v31 }
 0x36b   : > { %667 = vmatprep.mubr.f32.mxu1 %v598_v30  ;;  %v675_v50 = vmul.f32 0.5, %v598_v30 }
 0x36c   : > { %668 = vmatmul.mubr.f32.vlgmr.msra.gmra.mrb[2].mxu1 %v597_v31 }
 0x43f   : > { %v669_v36 = vpop.f32.mrb[2].mxu1 }
 0x440   : > { %v670_v37 = vadd.f32 %v871_v32, %v669_v36  ;;  %v671_v38 = vpop.f32.mrb[3].mxu1 }
 0x441   : > { %v672_v41 = vadd.f32 %v872_v35, %v671_v38 }
 0x442   : > { %1242 = vtanh.f32 %v670_v37 }
 0x443   : > { %1244 = vtanh.f32 %v672_v41 }
 0x44c   : > { %v1243_v44 = vpop.eup %1242 }
 0x44d   : > { %v1245_v45 = vpop.eup %1244  ;;  %v678_v49 = vmul.f32 0.5, %v1243_v44  ;;  %696 = sbr.rel (%p875_p8) target bundleno = 1109 (0x455), region = 48 }
 0x44e   : > { %v679_v51 = vmul.f32 0.5, %v1245_v45 }
 0x44f   : > { %v680_v5 = vadd.f32 %v678_v49, %v674_v48 }
 0x450   : > { %v681_v54 = vadd.f32 %v679_v51, %v675_v50 }
 0x451   : > { %873 = vst [vmem:[%s1653_s30 + $0x30] sm:$0xff] %v680_v5  ;;  %v689_v55 = vsel %vm688_vm3, %v680_v5, %v597_v31 }
 0x452   : > { %691 = vst [vmem:[#allocation3] sm:$0xff] %v689_v55  ;;  %874 = vst [vmem:[%s1653_s30 + $0x38] sm:$0xff] %v681_v54  ;;  %v690_v56 = vsel %vm688_vm3, %v681_v54, %v598_v30 }
 0x453   : > { %692 = vst [vmem:[#allocation3 + $0x8] sm:$0xff] %v690_v56  ;;  %697 = vst [vmem:[#allocation11] sm:$0xff] (!%p875_p8), %v689_v55 }
 0x454   : > { %698 = vst [vmem:[#allocation11 + $0x8] sm:$0xff] %v690_v56 }
 0x455 PF: > { %s888_s6 = sshll.u32 %s1436_s18, 10  ;;  %s716_s11 = sshll.u32 %s1653_s30, 4  ;;  %s1896_s11 = int_to_ptr.vmem [resolvable:$true] %s716_s11 }
 0x456   : > { %s1893_s5 = scalar_lea.hbm %s1969_s3, %s888_s6  ;;  %s700_s7 = scalar_lea.sflag [#allocation7], %s1639_s22 }
 0x457   : > { %s1326_s26 = scalar_lea.vmem %s1896_s11, 1024  ;;  %p1995_p10 = scmp.ne.s32.totalorder %s1983_s28, 0 }
 0x458   : > { %p1327_p5 = scmp.ne.s32.totalorder %s1896_s11, %s1326_s26  ;;  %s1451_s27 = smov [#allocation10]  }
 0x459   : > { %s1330_s12 = sshll.u32 %s1451_s27, 4  ;;  %s1331_s12 = int_to_ptr.vmem [resolvable:$false] %s1330_s12 }
 0x45a   : > { %p1328_p11 = pnand %p1327_p5, %p1995_p10  ;;  %s1332_s18 = scalar_lea.vmem %s1331_s12, 2048 }
 0x45b   : > { %p1333_p0 = scmp.lt.s32.totalorder %s1896_s11, %s1331_s12  ;;  %p1334_p4 = scmp.lt.s32.totalorder %s1332_s18, %s1326_s26 }
 0x45c   : > { %p1329_p13 = pneg %p1328_p11 }
 0x45d   : > { %p1335_p3 = por %p1334_p4, %p1333_p0 }
 0x45f   : > { %p1336_p7 = pnand %p1335_p3, %p1329_p13 }
 0x461   : > { %1339 = shalt.err (!%p1336_p7)
}
 0x462   : > { %s1340_s30 = scalar_lea.hbm %s1893_s5, 1024  ;;  %s1344_s8 = scalar_lea.hbm %s1969_s3, 3072 }
 0x463   : > { %p1341_p12 = scmp.ne.s32.totalorder %s1893_s5, %s1340_s30  ;;  %p1345_p9 = scmp.lt.u32.totalorder %s1893_s5, %s1969_s3 }
 0x464   : > { %p1346_p1 = scmp.lt.u32.totalorder %s1344_s8, %s1340_s30  ;;  %p1348_p5 = scmp.lt.u32.totalorder %s1340_s30, %s1893_s5 }
 0x465   : > { %p1342_p2 = pnand %p1341_p12, %p1995_p10 }
 0x466   : > { %p1347_p8 = por %p1346_p1, %p1345_p9 }
 0x467   : > { %p1343_p6 = pneg %p1342_p2 }
 0x468   : > { %p1349_p11 = por %p1348_p5, %p1347_p8 }
 0x46a   : > { %p1350_p13 = pnand %p1349_p11, %p1343_p6 }
 0x46c   : > { %1353 = shalt.err (!%p1350_p13)
}
 0x46d   : > { %s1452_s14 = smov 256   ;;  %s1453_s23 = smov 16  }
 0x46e   : > { %1151 = dma.vmem_to_hbm [thread:$0]  (%p1995_p10), %s1896_s11, 1024, %s1893_s5, %s700_s7, %s1452_s14, %s1452_s14, %s1453_s23  }
 0x46f   : > { %s1454_s26 = smov [#allocation11]   ;;  %p1996_p4 = scmp.ne.s32.totalorder %s1980_s25, 0 }
 0x470   : > { %s733_s27 = sshll.u32 %s1454_s26, 4  ;;  %s734_s27 = int_to_ptr.vmem [resolvable:$true] %s733_s27 }
 0x471   : > { %s1354_s12 = scalar_lea.vmem %s734_s27, 256  ;;  %p1361_p12 = scmp.lt.s32.totalorder %s734_s27, %s734_s27 }
 0x472   : > { %p1355_p0 = scmp.ne.s32.totalorder %s734_s27, %s1354_s12  ;;  %p1362_p2 = scmp.lt.s32.totalorder %s1354_s12, %s1354_s12 }
 0x474   : > { %p1356_p3 = pnand %p1355_p0, %p1996_p4  ;;  %p1363_p6 = por %p1362_p2, %p1361_p12 }
 0x476   : > { %p1357_p7 = pneg %p1356_p3 }
 0x478   : > { %p1364_p9 = pnand %p1363_p6, %p1357_p7 }
 0x47a   : > { %1367 = shalt.err (!%p1364_p9)
}
 0x47b   : > { %s1368_s28 = scalar_lea.hbm %s1970_s4, 256 }
 0x47c   : > { %p1369_p10 = scmp.ne.s32.totalorder %s1970_s4, %s1368_s28  ;;  %p1374_p5 = scmp.lt.u32.totalorder %s1368_s28, %s1970_s4 }
 0x47e   : > { %p1370_p1 = pnand %p1369_p10, %p1996_p4 }
 0x480   : > { %p1371_p8 = pneg %p1370_p1 }
 0x482   : > { %p1376_p11 = pnand %p1374_p5, %p1371_p8 }
 0x484   : > { %1379 = shalt.err (!%p1376_p11)
}
 0x485   : > { %1153 = dma.vmem_to_hbm [thread:$0]  (%p1996_p4), %s734_s27, 256, %s1970_s4, [#allocation12]  }
 0x486   : > { %1415 = dma.done.wait (%p1996_p4), [#allocation12], 256  }
 0x487   : > { %1417 = vsyncadd (%p1996_p4), [#allocation12], 4294967040 }
 0x488 PF: > { %p1174_p13 = scmp.ge.s32.totalorder %s1444_s20, 2  ;;  %s749_s8 = sand.u32 1, %s1424_s15  }
 0x489   : > { %p1997_p0 = scmp.ne.s32.totalorder %s1984_s29, 0  ;;  %s750_s24 = scalar_lea.sflag [#allocation7], %s749_s8 }
 0x48b   : > { %p1166_p3 = pnand %p1174_p13, %p1997_p0 }
 0x48d   : > { %1419 = dma.done.wait (!%p1166_p3), %s750_s24, 1024  }
 0x48e   : > { %1421 = vsyncadd (!%p1166_p3), %s750_s24, 4294966272  ;;  %s23_s20 = sadd.s32 1, %s1444_s20   ;;  %s1998_s15 = smov %s1428_s16 }
 0x48f   : > { %p20_p7 = scmp.ge.s32.totalorder %s23_s20, 5   ;;  %s1999_s16 = smov %s1432_s17 }
 0x490   : > { %s2000_s17 = smov %s1604_s10  ;;  %s2001_s18 = smov %s1440_s19 }
 0x491   : > { %s2002_s19 = smov %s2004_s9  ;;  %22 = sbr.rel (!%p20_p7) target bundleno = 8 (0x8), region = 105 }
 0x498   :  { %755 = vsyncpa [#allocation6], 1 }
 0x499   :  { %757 = vsyncpa [#allocation6 + $0x1], 1 }
 0x49a   :  { %758 = vsyncpa [#allocation9], 1 }
 0x49b   :  { %759 = vsyncpa [#allocation7], 1 }
 0x49c   :  { %761 = vsyncpa [#allocation7 + $0x1], 1 }
 0x49d   :  { %762 = vsyncpa [#allocation12], 1 }
 0x49e   :  { %763 = vsyncmov [#allocation4] }
 0x4a1   :  { %s764_s25 = vpop.sfrf %763 }
 0x4a2   :  { %p884_p4 = scmp.ne.s32.totalorder %s764_s25, 0 }
 0x4a4   :  { %768 = shalt.err (%p884_p4)  }

</bundles_post_ra>
